<compile_context>
chip_gen: v7x
topology: tpu7x:2x2x1
jax: 0.10.0
libtpu: 0.0.40
codegen_flags: <defaults>
</compile_context>

<pallas_src>
import functools

import jax
import jax.numpy as jnp
from jax.experimental import pallas as pl
from jax.experimental.pallas import tpu as pltpu


def _wce_kernel(fine_ref, coarse_ref, tgt_ref, w_ref,
                acc_f_ref, acc_c_ref, acc_w_ref,
                *, n_rows, block_rows, tiles_per_core):
    core = pl.program_id(0)
    step = pl.program_id(1)

    @pl.when(step == 0)
    def _init():
        acc_f_ref[...] = jnp.zeros_like(acc_f_ref)
        acc_c_ref[...] = jnp.zeros_like(acc_c_ref)
        acc_w_ref[...] = jnp.zeros_like(acc_w_ref)

    # Global (unclamped) row offset of this tile. The index_map clamps the
    # actual DMA block index, so an overshoot tile simply re-reads the last
    # valid tile and is fully masked out here.
    row0 = (core * tiles_per_core + step) * block_rows
    row_iota = jax.lax.broadcasted_iota(jnp.int32, (block_rows, 1), 0)
    row_valid = (row0 + row_iota) < n_rows                    # (TN, 1) bool

    tgt = tgt_ref[...]                                        # (TN, 1) int32
    cls_w = w_ref[...].astype(jnp.float32)                    # (1, C)

    c = cls_w.shape[-1]
    col = jax.lax.broadcasted_iota(jnp.int32, (1, c), 1)      # (1, C)
    mask = col == tgt                                         # (TN, C)

    # Per-sample class weight w[t_i]; zero for invalid (padded / OOB) rows.
    samp_w = jnp.sum(jnp.where(mask, cls_w, 0.0), axis=-1, keepdims=True)
    samp_w = jnp.where(row_valid, samp_w, 0.0)                # (TN, 1)

    def weighted_nll(x_ref):
        # Mask invalid rows BEFORE max/exp so undefined OOB contents (possibly
        # NaN/Inf) cannot poison the log-sum-exp (0 * NaN would still be NaN).
        x = jnp.where(row_valid, x_ref[...].astype(jnp.float32), 0.0)
        m = jnp.max(x, axis=-1, keepdims=True)
        lse = m + jnp.log(jnp.sum(jnp.exp(x - m), axis=-1, keepdims=True))
        picked = jnp.sum(jnp.where(mask, x, 0.0), axis=-1, keepdims=True)
        return samp_w * (lse - picked)                        # (TN, 1)

    acc_f_ref[...] += weighted_nll(fine_ref)
    acc_c_ref[...] += weighted_nll(coarse_ref)
    acc_w_ref[...] += samp_w


def _round_up(x, m):
    return ((x + m - 1) // m) * m


def _vmem_budget():
    """(tile budget bytes, vmem_limit_bytes) tuned per TPU generation."""
    try:
        cap = int(pltpu.get_tpu_info().vmem_capacity_bytes)
    except Exception:  # info unavailable -> conservative defaults
        cap = 0
    mib = 1024 * 1024
    if cap >= 100 * mib:          # v5e / v6e: 128 MiB physical VMEM
        return 48 * mib, 64 * mib
    if cap > 0:                   # v7x: 64 MiB per TensorCore
        return 36 * mib, 48 * mib
    return 24 * mib, 32 * mib


def weighted_ce_loss(fine_pred, coarse_pred, targets, class_weights,
                     fine_weight=0.65, coarse_weight=0.35, block_rows=None):
    """fine_pred, coarse_pred: (N, C) float (f32 or bf16); targets: (N,) int;
    class_weights: (C,) float. Returns (tot_loss, fine_loss, coarse_loss)."""
    n, c = fine_pred.shape
    budget, vmem_limit = _vmem_budget()

    if block_rows is None:
        itemsize = jnp.dtype(fine_pred.dtype).itemsize
        # 2 heads x 2 pipeline buffers of the input dtype + headroom for f32
        # working copies / elementwise temporaries inside the kernel.
        bytes_per_row = 2 * 2 * c * itemsize + 4 * c * 4
        block_rows = (budget // max(bytes_per_row, 1)) // 8 * 8
        block_rows = max(8, min(4096, block_rows))
    block_rows = max(1, int(block_rows))
    if n >= 8:
        block_rows = max(8, _round_up(block_rows, 8))
        block_rows = min(block_rows, (n // 8) * 8)   # keep block <= array dim
    else:
        block_rows = n                               # full (tiny) batch dim

    n_tiles = pl.cdiv(n, block_rows)
    num_cores = 2 if n_tiles >= 2 else 1             # v7x: 2 TCs; else serial
    tiles_per_core = pl.cdiv(n_tiles, num_cores)

    tgt2d = targets.astype(jnp.int32).reshape(n, 1)
    w2d = class_weights.astype(jnp.float32).reshape(1, c)

    def row_map(core, i):
        # Clamp so an overshoot tile never issues an out-of-bounds DMA; the
        # kernel masks it away using the unclamped global row index.
        return (jnp.minimum(core * tiles_per_core + i, n_tiles - 1), 0)

    kernel = functools.partial(
        _wce_kernel, n_rows=n, block_rows=block_rows,
        tiles_per_core=tiles_per_core)

    acc_shape = jax.ShapeDtypeStruct((num_cores, block_rows, 1), jnp.float32)
    acc_spec = pl.BlockSpec((None, block_rows, 1),
                            lambda core, i: (core, 0, 0))

    acc_f, acc_c, acc_w = pl.pallas_call(
        kernel,
        grid=(num_cores, tiles_per_core),
        in_specs=[
            pl.BlockSpec((block_rows, c), row_map),          # fine logits
            pl.BlockSpec((block_rows, c), row_map),          # coarse logits
            pl.BlockSpec((block_rows, 1), row_map),          # targets
            pl.BlockSpec((1, c), lambda core, i: (0, 0)),    # class weights
        ],
        out_specs=(acc_spec, acc_spec, acc_spec),
        out_shape=(acc_shape, acc_shape, acc_shape),
        compiler_params=pltpu.CompilerParams(
            dimension_semantics=("parallel", "arbitrary"),
            vmem_limit_bytes=vmem_limit,
        ),
    )(fine_pred, coarse_pred, tgt2d, w2d)

    # Tiny final reduction / combine in plain JAX (per-core partial sums).
    sum_w = jnp.sum(acc_w)
    fine_loss = jnp.sum(acc_f) / sum_w
    coarse_loss = jnp.sum(acc_c) / sum_w
    tot = fine_weight * fine_loss + coarse_weight * coarse_loss
    return tot, fine_loss, coarse_loss


def _reference(fine_pred, coarse_pred, targets, class_weights,
               fine_weight=0.65, coarse_weight=0.35):
    def ce(x):
        logp = jax.nn.log_softmax(x.astype(jnp.float32), axis=-1)
        nll = -jnp.take_along_axis(logp, targets[:, None], axis=-1)[:, 0]
        w = class_weights[targets].astype(jnp.float32)
        return jnp.sum(w * nll) / jnp.sum(w)
    f = ce(fine_pred)
    cl = ce(coarse_pred)
    return fine_weight * f + coarse_weight * cl, f, cl


if __name__ == "__main__":
    key = jax.random.PRNGKey(0)
    k1, k2, k3, k4 = jax.random.split(key, 4)

    # Deliberately awkward shapes: N not a multiple of the row tile, C not a
    # multiple of 128 -> exercises the pad-free masking paths.
    N, C = 21, 13
    fine_pred = jax.random.normal(k1, (N, C), dtype=jnp.float32)
    coarse_pred = jax.random.normal(k2, (N, C), dtype=jnp.float32)
    targets = jax.random.randint(k3, (N,), 0, C, dtype=jnp.int32)
    class_weights = jax.random.uniform(k4, (C,), dtype=jnp.float32,
                                       minval=0.5, maxval=2.0)

    # Small explicit block_rows -> multi-tile grid with a partial last tile
    # and a clamped overshoot tile on the second "core".
    tot, fine_loss, coarse_loss = weighted_ce_loss(
        fine_pred, coarse_pred, targets, class_weights, block_rows=8)
    jax.block_until_ready((tot, fine_loss, coarse_loss))

    ref_tot, ref_fine, ref_coarse = _reference(
        fine_pred, coarse_pred, targets, class_weights)
    assert jnp.allclose(tot, ref_tot, atol=1e-5), (tot, ref_tot)
    assert jnp.allclose(fine_loss, ref_fine, atol=1e-5), (fine_loss, ref_fine)
    assert jnp.allclose(coarse_loss, ref_coarse, atol=1e-5), (coarse_loss,
                                                              ref_coarse)

    # bf16 logits through the dtype/generation-aware auto-sized path.
    fine_bf = fine_pred.astype(jnp.bfloat16)
    coarse_bf = coarse_pred.astype(jnp.bfloat16)
    tot_b, fine_b, coarse_b = weighted_ce_loss(
        fine_bf, coarse_bf, targets, class_weights)
    jax.block_until_ready((tot_b, fine_b, coarse_b))
    ref_tot_b, _, _ = _reference(fine_bf, coarse_bf, targets, class_weights)
    assert jnp.allclose(tot_b, ref_tot_b, atol=1e-4), (tot_b, ref_tot_b)

    print("KERNEL_OK")
</pallas_src>

<mosaic_0001>
module attributes {stable_mosaic.version = 11 : i64} {
  func.func @_wce_kernel(%arg0: i32, %arg1: i32, %arg2: memref<8x13xf32, #tpu.memory_space<vmem>>, %arg3: memref<8x13xf32, #tpu.memory_space<vmem>>, %arg4: memref<8x1xi32, #tpu.memory_space<vmem>>, %arg5: memref<1x13xf32, #tpu.memory_space<vmem>>, %arg6: memref<1x8x1xf32, #tpu.memory_space<vmem>>, %arg7: memref<1x8x1xf32, #tpu.memory_space<vmem>>, %arg8: memref<1x8x1xf32, #tpu.memory_space<vmem>>) attributes {dimension_semantics = [#tpu.dimension_semantics<parallel>, #tpu.dimension_semantics<arbitrary>], iteration_bounds = array<i64: 2, 2>, scalar_prefetch = 0 : i64, scratch_operands = 0 : i64, tpu.core_type = #tpu.core_type<tc>, window_params = [{transform_indices = @transform_0, window_bounds = array<i64: 8, 13>}, {transform_indices = @transform_1, window_bounds = array<i64: 8, 13>}, {transform_indices = @transform_2, window_bounds = array<i64: 8, 1>}, {pipeline_mode = #tpu.pipeline_mode<synchronous>, transform_indices = @transform_3, window_bounds = array<i64: 1, 13>}, {transform_indices = @transform_4, window_bounds = array<i64: 1, 8, 1>}, {transform_indices = @transform_5, window_bounds = array<i64: 1, 8, 1>}, {transform_indices = @transform_6, window_bounds = array<i64: 1, 8, 1>}]} {
    %c0_i32 = arith.constant 0 : i32
    %0 = arith.cmpi eq, %arg1, %c0_i32 : i32
    %1 = arith.extui %0 : i1 to i32
    %c0_i32_0 = arith.constant 0 : i32
    %2 = arith.cmpi ne, %1, %c0_i32_0 : i32
    scf.if %2 {
      %cst_38 = arith.constant 0.000000e+00 : f32
      %83 = vector.broadcast %cst_38 : f32 to vector<8x1xf32>
      %c0_39 = arith.constant 0 : index
      %c0_40 = arith.constant 0 : index
      %c0_41 = arith.constant 0 : index
      %84 = vector.load %arg6[%c0_39, %c0_40, %c0_41] : memref<1x8x1xf32, #tpu.memory_space<vmem>>, vector<1x8x1xf32>
      %85 = vector.shape_cast %84 : vector<1x8x1xf32> to vector<8x1xf32>
      %86 = vector.shape_cast %83 : vector<8x1xf32> to vector<1x8x1xf32>
      tpu.vector_store %arg6[%c0_39, %c0_40, %c0_41], %86 {strides = array<i32>} : memref<1x8x1xf32, #tpu.memory_space<vmem>>, vector<1x8x1xf32>,
      %cst_42 = arith.constant 0.000000e+00 : f32
      %87 = vector.broadcast %cst_42 : f32 to vector<8x1xf32>
      %c0_43 = arith.constant 0 : index
      %c0_44 = arith.constant 0 : index
      %c0_45 = arith.constant 0 : index
      %88 = vector.load %arg7[%c0_43, %c0_44, %c0_45] : memref<1x8x1xf32, #tpu.memory_space<vmem>>, vector<1x8x1xf32>
      %89 = vector.shape_cast %88 : vector<1x8x1xf32> to vector<8x1xf32>
      %90 = vector.shape_cast %87 : vector<8x1xf32> to vector<1x8x1xf32>
      tpu.vector_store %arg7[%c0_43, %c0_44, %c0_45], %90 {strides = array<i32>} : memref<1x8x1xf32, #tpu.memory_space<vmem>>, vector<1x8x1xf32>,
      %cst_46 = arith.constant 0.000000e+00 : f32
      %91 = vector.broadcast %cst_46 : f32 to vector<8x1xf32>
      %c0_47 = arith.constant 0 : index
      %c0_48 = arith.constant 0 : index
      %c0_49 = arith.constant 0 : index
      %92 = vector.load %arg8[%c0_47, %c0_48, %c0_49] : memref<1x8x1xf32, #tpu.memory_space<vmem>>, vector<1x8x1xf32>
      %93 = vector.shape_cast %92 : vector<1x8x1xf32> to vector<8x1xf32>
      %94 = vector.shape_cast %91 : vector<8x1xf32> to vector<1x8x1xf32>
      tpu.vector_store %arg8[%c0_47, %c0_48, %c0_49], %94 {strides = array<i32>} : memref<1x8x1xf32, #tpu.memory_space<vmem>>, vector<1x8x1xf32>,
    } else {
    }
    %c2_i32 = arith.constant 2 : i32
    %3 = arith.muli %arg0, %c2_i32 : i32
    %4 = arith.addi %3, %arg1 : i32
    %c8_i32 = arith.constant 8 : i32
    %5 = arith.muli %4, %c8_i32 : i32
    %6 = tpu.iota {dimensions = array<i32: 0>} : vector<8x1xi32>
    %7 = vector.broadcast %5 : i32 to vector<8x1xi32>
    %8 = arith.addi %7, %6 : vector<8x1xi32>
    %c21_i32 = arith.constant 21 : i32
    %9 = vector.broadcast %c21_i32 : i32 to vector<8x1xi32>
    %10 = arith.cmpi slt, %8, %9 : vector<8x1xi32>
    %c0 = arith.constant 0 : index
    %c0_1 = arith.constant 0 : index
    %11 = vector.load %arg4[%c0, %c0_1] : memref<8x1xi32, #tpu.memory_space<vmem>>, vector<8x1xi32>
    %c0_2 = arith.constant 0 : index
    %c0_3 = arith.constant 0 : index
    %12 = vector.load %arg5[%c0_2, %c0_3] : memref<1x13xf32, #tpu.memory_space<vmem>>, vector<1x13xf32>
    %13 = tpu.iota {dimensions = array<i32: 1>} : vector<1x13xi32>
    %14 = vector.broadcast %13 : vector<1x13xi32> to vector<8x13xi32>
    %15 = vector.broadcast %11 : vector<8x1xi32> to vector<8x13xi32>
    %16 = arith.cmpi eq, %14, %15 : vector<8x13xi32>
    %cst = arith.constant 0.000000e+00 : f32
    %17 = vector.shape_cast %12 : vector<1x13xf32> to vector<1x13xf32>
    %18 = vector.broadcast %17 : vector<1x13xf32> to vector<8x13xf32>
    %19 = vector.broadcast %cst : f32 to vector<8x13xf32>
    %20 = arith.select %16, %18, %19 : vector<8x13xi1>, vector<8x13xf32>
    %cst_4 = arith.constant dense<0.000000e+00> : vector<8xf32>
    %21 = vector.multi_reduction <add>, %20, %cst_4 [1] : vector<8x13xf32> to vector<8xf32>
    %22 = vector.shape_cast %21 : vector<8xf32> to vector<8x1xf32>
    %cst_5 = arith.constant 0.000000e+00 : f32
    %23 = vector.broadcast %cst_5 : f32 to vector<8x1xf32>
    %24 = arith.select %10, %22, %23 : vector<8x1xi1>, vector<8x1xf32>
    %c0_6 = arith.constant 0 : index
    %c0_7 = arith.constant 0 : index
    %c0_8 = arith.constant 0 : index
    %25 = vector.load %arg6[%c0_6, %c0_7, %c0_8] : memref<1x8x1xf32, #tpu.memory_space<vmem>>, vector<1x8x1xf32>
    %26 = vector.shape_cast %25 : vector<1x8x1xf32> to vector<8x1xf32>
    %c0_9 = arith.constant 0 : index
    %c0_10 = arith.constant 0 : index
    %27 = vector.load %arg2[%c0_9, %c0_10] : memref<8x13xf32, #tpu.memory_space<vmem>>, vector<8x13xf32>
    %cst_11 = arith.constant 0.000000e+00 : f32
    %28 = vector.shape_cast %10 : vector<8x1xi1> to vector<8x1xi1>
    %29 = vector.broadcast %28 : vector<8x1xi1> to vector<8x13xi1>
    %30 = vector.broadcast %cst_11 : f32 to vector<8x13xf32>
    %31 = arith.select %29, %27, %30 : vector<8x13xi1>, vector<8x13xf32>
    %cst_12 = arith.constant dense<0xFF800000> : vector<8xf32>
    %32 = vector.multi_reduction <maximumf>, %31, %cst_12 [1] : vector<8x13xf32> to vector<8xf32>
    %33 = vector.shape_cast %32 : vector<8xf32> to vector<8x1xf32>
    %34 = vector.broadcast %33 : vector<8x1xf32> to vector<8x13xf32>
    %35 = arith.subf %31, %34 : vector<8x13xf32>
    %36 = math.exp %35 : vector<8x13xf32>
    %cst_13 = arith.constant dense<0.000000e+00> : vector<8xf32>
    %37 = vector.multi_reduction <add>, %36, %cst_13 [1] : vector<8x13xf32> to vector<8xf32>
    %38 = vector.shape_cast %37 : vector<8xf32> to vector<8x1xf32>
    %39 = math.log %38 : vector<8x1xf32>
    %40 = arith.addf %33, %39 : vector<8x1xf32>
    %cst_14 = arith.constant 0.000000e+00 : f32
    %41 = vector.broadcast %cst_14 : f32 to vector<8x13xf32>
    %42 = arith.select %16, %31, %41 : vector<8x13xi1>, vector<8x13xf32>
    %cst_15 = arith.constant dense<0.000000e+00> : vector<8xf32>
    %43 = vector.multi_reduction <add>, %42, %cst_15 [1] : vector<8x13xf32> to vector<8xf32>
    %44 = vector.shape_cast %43 : vector<8xf32> to vector<8x1xf32>
    %45 = arith.subf %40, %44 : vector<8x1xf32>
    %46 = arith.mulf %24, %45 : vector<8x1xf32>
    %47 = arith.addf %26, %46 : vector<8x1xf32>
    %c0_16 = arith.constant 0 : index
    %c0_17 = arith.constant 0 : index
    %c0_18 = arith.constant 0 : index
    %48 = vector.load %arg6[%c0_16, %c0_17, %c0_18] : memref<1x8x1xf32, #tpu.memory_space<vmem>>, vector<1x8x1xf32>
    %49 = vector.shape_cast %48 : vector<1x8x1xf32> to vector<8x1xf32>
    %50 = vector.shape_cast %47 : vector<8x1xf32> to vector<1x8x1xf32>
    tpu.vector_store %arg6[%c0_16, %c0_17, %c0_18], %50 {strides = array<i32>} : memref<1x8x1xf32, #tpu.memory_space<vmem>>, vector<1x8x1xf32>,
    %c0_19 = arith.constant 0 : index
    %c0_20 = arith.constant 0 : index
    %c0_21 = arith.constant 0 : index
    %51 = vector.load %arg7[%c0_19, %c0_20, %c0_21] : memref<1x8x1xf32, #tpu.memory_space<vmem>>, vector<1x8x1xf32>
    %52 = vector.shape_cast %51 : vector<1x8x1xf32> to vector<8x1xf32>
    %c0_22 = arith.constant 0 : index
    %c0_23 = arith.constant 0 : index
    %53 = vector.load %arg3[%c0_22, %c0_23] : memref<8x13xf32, #tpu.memory_space<vmem>>, vector<8x13xf32>
    %cst_24 = arith.constant 0.000000e+00 : f32
    %54 = vector.shape_cast %10 : vector<8x1xi1> to vector<8x1xi1>
    %55 = vector.broadcast %54 : vector<8x1xi1> to vector<8x13xi1>
    %56 = vector.broadcast %cst_24 : f32 to vector<8x13xf32>
    %57 = arith.select %55, %53, %56 : vector<8x13xi1>, vector<8x13xf32>
    %cst_25 = arith.constant dense<0xFF800000> : vector<8xf32>
    %58 = vector.multi_reduction <maximumf>, %57, %cst_25 [1] : vector<8x13xf32> to vector<8xf32>
    %59 = vector.shape_cast %58 : vector<8xf32> to vector<8x1xf32>
    %60 = vector.broadcast %59 : vector<8x1xf32> to vector<8x13xf32>
    %61 = arith.subf %57, %60 : vector<8x13xf32>
    %62 = math.exp %61 : vector<8x13xf32>
    %cst_26 = arith.constant dense<0.000000e+00> : vector<8xf32>
    %63 = vector.multi_reduction <add>, %62, %cst_26 [1] : vector<8x13xf32> to vector<8xf32>
    %64 = vector.shape_cast %63 : vector<8xf32> to vector<8x1xf32>
    %65 = math.log %64 : vector<8x1xf32>
    %66 = arith.addf %59, %65 : vector<8x1xf32>
    %cst_27 = arith.constant 0.000000e+00 : f32
    %67 = vector.broadcast %cst_27 : f32 to vector<8x13xf32>
    %68 = arith.select %16, %57, %67 : vector<8x13xi1>, vector<8x13xf32>
    %cst_28 = arith.constant dense<0.000000e+00> : vector<8xf32>
    %69 = vector.multi_reduction <add>, %68, %cst_28 [1] : vector<8x13xf32> to vector<8xf32>
    %70 = vector.shape_cast %69 : vector<8xf32> to vector<8x1xf32>
    %71 = arith.subf %66, %70 : vector<8x1xf32>
    %72 = arith.mulf %24, %71 : vector<8x1xf32>
    %73 = arith.addf %52, %72 : vector<8x1xf32>
    %c0_29 = arith.constant 0 : index
    %c0_30 = arith.constant 0 : index
    %c0_31 = arith.constant 0 : index
    %74 = vector.load %arg7[%c0_29, %c0_30, %c0_31] : memref<1x8x1xf32, #tpu.memory_space<vmem>>, vector<1x8x1xf32>
    %75 = vector.shape_cast %74 : vector<1x8x1xf32> to vector<8x1xf32>
    %76 = vector.shape_cast %73 : vector<8x1xf32> to vector<1x8x1xf32>
    tpu.vector_store %arg7[%c0_29, %c0_30, %c0_31], %76 {strides = array<i32>} : memref<1x8x1xf32, #tpu.memory_space<vmem>>, vector<1x8x1xf32>,
    %c0_32 = arith.constant 0 : index
    %c0_33 = arith.constant 0 : index
    %c0_34 = arith.constant 0 : index
    %77 = vector.load %arg8[%c0_32, %c0_33, %c0_34] : memref<1x8x1xf32, #tpu.memory_space<vmem>>, vector<1x8x1xf32>
    %78 = vector.shape_cast %77 : vector<1x8x1xf32> to vector<8x1xf32>
    %79 = arith.addf %78, %24 : vector<8x1xf32>
    %c0_35 = arith.constant 0 : index
    %c0_36 = arith.constant 0 : index
    %c0_37 = arith.constant 0 : index
    %80 = vector.load %arg8[%c0_35, %c0_36, %c0_37] : memref<1x8x1xf32, #tpu.memory_space<vmem>>, vector<1x8x1xf32>
    %81 = vector.shape_cast %80 : vector<1x8x1xf32> to vector<8x1xf32>
    %82 = vector.shape_cast %79 : vector<8x1xf32> to vector<1x8x1xf32>
    tpu.vector_store %arg8[%c0_35, %c0_36, %c0_37], %82 {strides = array<i32>} : memref<1x8x1xf32, #tpu.memory_space<vmem>>, vector<1x8x1xf32>,
    return
  }
  func.func @transform_0(%arg0: i32, %arg1: i32) -> (i32, i32) {
    %c2_i32 = arith.constant 2 : i32
    %0 = arith.muli %arg0, %c2_i32 : i32
    %1 = arith.addi %0, %arg1 : i32
    %c2_i32_0 = arith.constant 2 : i32
    %2 = arith.minsi %1, %c2_i32_0 : i32
    %c0_i32 = arith.constant 0 : i32
    %c0_i32_1 = arith.constant 0 : i32
    return %2, %c0_i32 : i32, i32
  }
  func.func @transform_1(%arg0: i32, %arg1: i32) -> (i32, i32) {
    %c2_i32 = arith.constant 2 : i32
    %0 = arith.muli %arg0, %c2_i32 : i32
    %1 = arith.addi %0, %arg1 : i32
    %c2_i32_0 = arith.constant 2 : i32
    %2 = arith.minsi %1, %c2_i32_0 : i32
    %c0_i32 = arith.constant 0 : i32
    %c0_i32_1 = arith.constant 0 : i32
    return %2, %c0_i32 : i32, i32
  }
  func.func @transform_2(%arg0: i32, %arg1: i32) -> (i32, i32) {
    %c2_i32 = arith.constant 2 : i32
    %0 = arith.muli %arg0, %c2_i32 : i32
    %1 = arith.addi %0, %arg1 : i32
    %c2_i32_0 = arith.constant 2 : i32
    %2 = arith.minsi %1, %c2_i32_0 : i32
    %c0_i32 = arith.constant 0 : i32
    %c0_i32_1 = arith.constant 0 : i32
    return %2, %c0_i32 : i32, i32
  }
  func.func @transform_3(%arg0: i32, %arg1: i32) -> (i32, i32) {
    %c0_i32 = arith.constant 0 : i32
    %c0_i32_0 = arith.constant 0 : i32
    %c0_i32_1 = arith.constant 0 : i32
    return %c0_i32, %c0_i32_0 : i32, i32
  }
  func.func @transform_4(%arg0: i32, %arg1: i32) -> (i32, i32, i32) {
    %c0_i32 = arith.constant 0 : i32
    %c0_i32_0 = arith.constant 0 : i32
    %c0_i32_1 = arith.constant 0 : i32
    return %arg0, %c0_i32, %c0_i32_0 : i32, i32, i32
  }
  func.func @transform_5(%arg0: i32, %arg1: i32) -> (i32, i32, i32) {
    %c0_i32 = arith.constant 0 : i32
    %c0_i32_0 = arith.constant 0 : i32
    %c0_i32_1 = arith.constant 0 : i32
    return %arg0, %c0_i32, %c0_i32_0 : i32, i32, i32
  }
  func.func @transform_6(%arg0: i32, %arg1: i32) -> (i32, i32, i32) {
    %c0_i32 = arith.constant 0 : i32
    %c0_i32_0 = arith.constant 0 : i32
    %c0_i32_1 = arith.constant 0 : i32
    return %arg0, %c0_i32, %c0_i32_0 : i32, i32, i32
  }
}

</mosaic_0001>

<bundles_post_ra>
// kernel: tpu_custom_call.1
= control target key start
LH: loop header
LB: loop body
LE: loop exit
PB: predicated region body
PF: predicated region fallthrough
CT: control target
= control target key end

     0   :  { %s800_s21 = smov 0   ;;  %s802_s22 = smov 0   ;;  %s895_s0 = inlined_call_operand.vmem [shape: f32[21,13], index: 0, kind: input, shape index: {}]   ;;  %s896_s1 = inlined_call_operand.vmem [shape: f32[21,13], index: 1, kind: input, shape index: {}]   ;;  %s897_s2 = inlined_call_operand.vmem [shape: s32[21,1], index: 2, kind: input, shape index: {}]   ;;  %s898_s3 = inlined_call_operand.vmem [shape: f32[1,13], index: 3, kind: input, shape index: {}]   ;;  %s899_s4 = inlined_call_operand.vmem [shape: f32[2,8,1], index: 4, kind: output, shape index: {0}]   ;;  %s900_s5 = inlined_call_operand.vmem [shape: f32[2,8,1], index: 5, kind: output, shape index: {1}]   ;;  %s901_s6 = inlined_call_operand.vmem [shape: f32[2,8,1], index: 6, kind: output, shape index: {2}]  }
   0x1   :  { %902 = sst [smem:[#allocation2_spill]] %s899_s4  ;;  %s804_s23 = smov 0  }
   0x2   :  { %s806_s24 = smov 0   ;;  %s808_s25 = smov 0  }
   0x3 LB: > { %s26_s26 = sadd.s32 1, %s753_s23  ;;  %s29_s27 = sadd.s32 1, %s757_s24  ;;  %s761_s25 = sphi %s808_s25, %s17_s25   ;;  %s757_s24 = sphi %s806_s24, %s907_s24   ;;  %s753_s23 = sphi %s804_s23, %s906_s23   ;;  %s749_s22 = sphi %s802_s22, %s905_s22   ;;  %s745_s21 = sphi %s800_s21, %s904_s21  }
   0x4   : > { %p27_p0 = scmp.ge.s32.totalorder %s26_s26, 2  ;;  %p646_p1 = scmp.ge.s32.totalorder %s761_s25, 1 }
   0x5   : > { %p294_p2 = scmp.lt.s32.totalorder %s761_s25, 5 }
   0x6   : > { %s909_s26 = smov (%p27_p0, %s26_s26), 0  ;;  %s911_s27 = smov (!%p27_p0, %s29_s27), %s757_s24 }
   0x7   : > { %p295_p3 = pnand %p646_p1, %p294_p2  ;;  %p31_p4 = scmp.ge.s32.totalorder %s911_s27, 2 }
   0x8   : > { %s647_s28 = sshll.u32 (!%p295_p3), %s749_s22, 1  ;;  %p386_p5 = scmp.lt.s32.totalorder (!%p295_p3), %s749_s22, 1 }
   0x9   : > { %s913_s27 = smov (%p31_p4, %s911_s27), 0  ;;  %298 = sbr.rel (%p295_p3) target bundleno = 358 (0x166), region = 36 }
   0xa   : > { %s351_s29 = sadd.s32 (!%p295_p3), %s745_s21, %s647_s28  ;;  %s903_s4 = sld [smem:[#allocation2_spill]] (!%p295_p3) }
   0xb   : > { %p352_p6 = scmp.lt.s32.totalorder (!%p295_p3), %s351_s29, 2  ;;  %p665_p7 = scmp.ne.s32.totalorder (!%p295_p3), %s745_s21, 0 }
  0x10   : > { %s915_s22 = smov (!%p386_p5, %s749_s22), 1  ;;  %401 = sbr.rel (%p665_p7) target bundleno = 23 (0x17), region = 40 }
  0x11   : > { %s353_s30 = scalar_select %p352_p6, %s351_s29, 2 }
  0x12   : > { %s662_s7 = sshll.u32 %s915_s22, 3  ;;  %vm402_vm0 = vcmask (!%p665_p7), 7168   ;;  %v763_v0 = vmov (!%p665_p7), 0.0  }
  0x13   : > { %s917_s30 = smov (!%p352_p6, %s353_s30), 2  ;;  %s836_s10 = scalar_lea.vmem %s903_s4, %s662_s7 }
  0x14   : > { %s841_s13 = scalar_lea.vmem %s900_s5, %s662_s7  ;;  %s651_s14 = sshll.u32 %s917_s30, 3  ;;  %403 = vst.msk [vmem:[%s836_s10] sm:$0xff] (!%p665_p7), %vm402_vm0, %v763_v0 }
  0x15   : > { %s846_s17 = scalar_lea.vmem %s901_s6, %s662_s7  ;;  %s357_s20 = scalar_lea.vmem %s895_s0, %s651_s14  ;;  %404 = vst.msk [vmem:[%s841_s13] sm:$0xff] (!%p665_p7), %vm402_vm0, %v763_v0 }
  0x16   : > { %s369_s8 = scalar_lea.vmem %s896_s1, %s651_s14  ;;  %s381_s11 = scalar_lea.vmem %s897_s2, %s651_s14  ;;  %405 = vst.msk [vmem:[%s846_s17] sm:$0xff] (!%p665_p7), %vm402_vm0, %v763_v0 }
  0x17 PF: > { %s667_s30 = sshll.u32 %s351_s29, 3  ;;  %v409_v1 = vlaneseq  ;;  %v414_v2 = vld [vmem:[%s381_s11] sm:$0xff]  ;;  %v764_v4 = vmov 0   ;;  %vm429_vm1 = vcmask 105472   ;;  %vm458_vm4 = vcmask 7168  }
  0x18   : > { %v411_v3 = vstv %s667_s30  ;;  %713 = vset.pattern.permute.xlu1 %v764_v4  ;;  %714 = vset.pattern.permute.xlu0 %v764_v4  ;;  %v435_v7 = vld [vmem:[%s357_s20] sm:$0xff] }
  0x19   : > { %v410_v5 = vshrl.u32 %v409_v1, 7  ;;  %419 = vperm.xlu1 %713, %v414_v2   ;;  %v461_v8 = vld [vmem:[%s369_s8] sm:$0xff]  ;;  %v417_v19 = vand.u32 127, %v409_v1 }
  0x1a   : > { %v668_v29 = vld [vmem:[%s898_s3] ss:$0 sm:$0xff] }
  0x1b   : > { %v412_v6 = vadd.s32 %v411_v3, %v410_v5  ;;  %v434_v44 = vld [vmem:[%s836_s10] sm:$0xff] }
  0x1c   : > { %v460_v51 = vld [vmem:[%s841_s13] sm:$0xff] }
  0x1d   : > { %vm413_vm2 = vcmp.lt.s32.totalorder %v412_v6, 21  ;;  %v483_v40 = vld [vmem:[%s846_s17] sm:$0xff] }
  0x1e   : > { %v438_v9 = vsel %vm413_vm2, %v435_v7, 0.0  ;;  %v462_v10 = vsel %vm413_vm2, %v461_v8, 0.0 }
  0x1f   : > { %v439_v11 = vsel %vm429_vm1, %v438_v9, -inf  ;;  %v463_v12 = vsel %vm429_vm1, %v462_v10, -inf }
  0x20   : > { %440 = vmax.xlane.f32.xlu0 %v439_v11 }
  0x24   : > { %464 = vmax.xlane.f32.xlu0 %v463_v12 }
  0x98   : > { %v420_v20 = vpop.permute.xlu1 %419 }
  0x99   : > { %vm421_vm3 = vcmp.eq.s32.totalorder %v417_v19, %v420_v20 }
  0x9a   : > { %v451_v24 = vsel %vm421_vm3, %v438_v9, 0.0  ;;  %v475_v27 = vsel %vm421_vm3, %v462_v10, 0.0  ;;  %v428_v30 = vsel %vm421_vm3, %v668_v29, 0.0 }
  0x9b   : > { %v452_v26 = vsel %vm429_vm1, %v451_v24, 0.0  ;;  %v476_v28 = vsel %vm429_vm1, %v475_v27, 0.0  ;;  %v430_v31 = vsel %vm429_vm1, %v428_v30, 0.0 }
  0xad   : > { %v441_v13 = vpop.xlane.xlu0 %440 }
  0xae   : > { %v442_v14 = vsub.f32 %v438_v9, %v441_v13 }
  0xb0   : > { %v443_v15 = vmul.f32 1.442695, %v442_v14 }
  0xb1   : > { %v465_v16 = vpop.xlane.xlu0 %464 }
  0xb2   : > { %715 = vpow2.f32 %v443_v15  ;;  %v466_v17 = vsub.f32 %v462_v10, %v465_v16 }
  0xb4   : > { %v467_v18 = vmul.f32 1.442695, %v466_v17 }
  0xb6   : > { %717 = vpow2.f32 %v467_v18 }
  0xbc   : > { %v716_v21 = vpop.eup %715 }
  0xbd   : > { %v445_v22 = vsel %vm429_vm1, %v716_v21, 0.0 }
  0xbe   : > { %446 = vadd.xlane.f32.xlu1 %v445_v22 }
  0xc0   : > { %v718_v23 = vpop.eup %717 }
  0xc1   : > { %v469_v25 = vsel %vm429_vm1, %v718_v23, 0.0 }
  0xc2   : > { %470 = vadd.xlane.f32.xlu0 %v469_v25 }
  0xc6   : > { %453 = vadd.xlane.f32.xlu0 %v452_v26 }
  0xca   : > { %477 = vadd.xlane.f32.xlu0 %v476_v28 }
  0xce   : > { %431 = vadd.xlane.f32.xlu0 %v430_v31 }
 0x14b   : > { %v447_v32 = vpop.xlane.xlu1 %446 }
 0x14c   : > { %719 = vlog2.f32 %v447_v32 }
 0x14f   : > { %v471_v33 = vpop.xlane.xlu0 %470 }
 0x150   : > { %721 = vlog2.f32 %v471_v33 }
 0x153   : > { %v454_v34 = vpop.xlane.xlu0 %453 }
 0x156   : > { %v720_v35 = vpop.eup %719 }
 0x157   : > { %v449_v36 = vmul.f32 0.6931472, %v720_v35  ;;  %v478_v37 = vpop.xlane.xlu0 %477 }
 0x159   : > { %v450_v38 = vadd.f32 %v449_v36, %v441_v13 }
 0x15a   : > { %v722_v39 = vpop.eup %721 }
 0x15b   : > { %v473_v41 = vmul.f32 0.6931472, %v722_v39  ;;  %v455_v42 = vsub.f32 %v450_v38, %v454_v34  ;;  %v432_v43 = vpop.xlane.xlu0 %431 }
 0x15c   : > { %v433_v45 = vsel %vm413_vm2, %v432_v43, 0.0 }
 0x15d   : > { %v474_v46 = vadd.f32 %v473_v41, %v465_v16  ;;  %v456_v47 = vmul.f32 %v455_v42, %v433_v45  ;;  %v484_v48 = vadd.f32 %v483_v40, %v433_v45 }
 0x15f   : > { %v479_v49 = vsub.f32 %v474_v46, %v478_v37  ;;  %v457_v50 = vadd.f32 %v456_v47, %v434_v44  ;;  %485 = vst.msk [vmem:[%s846_s17] sm:$0xff] %vm458_vm4, %v484_v48 }
 0x161   : > { %459 = vst.msk [vmem:[%s836_s10] sm:$0xff] %vm458_vm4, %v457_v50  ;;  %v480_v52 = vmul.f32 %v479_v49, %v433_v45 }
 0x163   : > { %v481_v53 = vadd.f32 %v480_v52, %v460_v51 }
 0x165   : > { %482 = vst.msk [vmem:[%s841_s13] sm:$0xff] %vm458_vm4, %v481_v53 }
 0x166 PF: > { %s17_s25 = sadd.s32 1, %s761_s25   ;;  %s904_s21 = smov %s753_s23 }
 0x167   : > { %p14_p8 = scmp.ge.s32.totalorder %s17_s25, 6   ;;  %s905_s22 = smov %s757_s24 }
 0x168   : > { %s906_s23 = smov %s909_s26  ;;  %s907_s24 = smov %s913_s27 }
 0x169   :  { %16 = sbr.rel (!%p14_p8) target bundleno = 3 (0x3), region = 100 }

</bundles_post_ra>
